<compile_context>
chip_gen: v7x
topology: tpu7x:2x2x1
jax: 0.10.0
libtpu: 0.0.40
codegen_flags: <defaults>
</compile_context>

<pallas_src>
import functools

import jax
import jax.numpy as jnp
from jax.experimental import pallas as pl
from jax.experimental.pallas import tpu as pltpu

HIDDEN = 128
LANE = 128


def _round_up(x: int, m: int) -> int:
    return ((x + m - 1) // m) * m


def _default_num_batch_tiles() -> int:
    """v7x has 2 TensorCores -> 2 parallel batch tiles; v5e/v6e -> 1 tile."""
    try:
        kind = jax.devices()[0].device_kind.lower()
    except Exception:  # pragma: no cover - defensive, e.g. no devices yet
        return 1
    return 2 if ("v7" in kind or "7x" in kind) else 1


def dqn_kernel(x_ref, w1_ref, b1_ref, w2_ref, b2_ref, w3_ref, b3_ref, out_ref):
    # Fused fc1 -> ReLU -> fc2 -> ReLU -> fc3: three bf16 MXU matmuls with f32
    # accumulation, VPU bias-add/ReLU, one lane-dense bf16 store.
    x = x_ref[...].astype(jnp.bfloat16)

    h1 = jnp.dot(x, w1_ref[...], preferred_element_type=jnp.float32) + b1_ref[...]
    h1 = jnp.maximum(h1, 0.0).astype(jnp.bfloat16)

    h2 = jnp.dot(h1, w2_ref[...], preferred_element_type=jnp.float32) + b2_ref[...]
    h2 = jnp.maximum(h2, 0.0).astype(jnp.bfloat16)

    q = jnp.dot(h2, w3_ref[...], preferred_element_type=jnp.float32) + b3_ref[...]
    out_ref[...] = q.astype(out_ref.dtype)          # full-width (tm, 128) vst


@functools.partial(
    jax.jit, static_argnames=("num_actions", "block_m", "num_batch_tiles"))
def dqn_forward(state, params, num_actions, *, block_m: int = 1024,
                num_batch_tiles: int | None = None):
    """state: (B, state_space_size) f32 -> Q values (B, num_actions) f32."""
    w1, b1, w2, b2, w3, b3 = params
    B, S = state.shape
    H = w1.shape[1]
    A_pad = w3.shape[1]            # fc3 already pre-padded to a 128-lane slab

    if num_batch_tiles is None:
        num_batch_tiles = _default_num_batch_tiles()

    # Batch tiling: either one full-extent tile (no padding needed, any B) or
    # num_batch_tiles 8-aligned tiles (capped at block_m for huge batches).
    block_m = max(8, _round_up(block_m, 8))
    tm = min(_round_up(pl.cdiv(B, num_batch_tiles), 8), block_m)
    if tm >= B:
        tm, B_pad, x = B, B, state                 # single tile, no batch pad
    else:
        B_pad = _round_up(B, tm)
        x = state if B_pad == B else jnp.pad(state, ((0, B_pad - B), (0, 0)))

    grid = (B_pad // tm,)

    # Grid-invariant operands: VMEM-resident, single-buffered, fetched once.
    resident = functools.partial(pl.BlockSpec, pipeline_mode=pl.Buffered(1))

    flops = 2 * B_pad * (S * H + H * H + H * A_pad)
    bytes_accessed = (
        B_pad * S * 4                              # x (f32)
        + (S * H + H * H + H * A_pad) * 2          # bf16 weights
        + (2 * H + A_pad) * 4                      # f32 biases
        + B_pad * A_pad * 2                        # bf16 output slab
    )

    out = pl.pallas_call(
        dqn_kernel,
        out_shape=jax.ShapeDtypeStruct((B_pad, A_pad), jnp.bfloat16),
        grid=grid,
        in_specs=[
            pl.BlockSpec((tm, S), lambda i: (i, 0)),       # x: tiled over batch
            resident((S, H), lambda i: (0, 0)),            # w1
            resident((1, H), lambda i: (0, 0)),            # b1
            resident((H, H), lambda i: (0, 0)),            # w2
            resident((1, H), lambda i: (0, 0)),            # b2
            resident((H, A_pad), lambda i: (0, 0)),        # w3 (pre-padded)
            resident((1, A_pad), lambda i: (0, 0)),        # b3 (pre-padded)
        ],
        out_specs=pl.BlockSpec((tm, A_pad), lambda i: (i, 0)),
        compiler_params=pltpu.CompilerParams(
            dimension_semantics=("parallel",),             # megacore-shard batch
        ),
        cost_estimate=pl.CostEstimate(
            flops=flops, transcendentals=0, bytes_accessed=bytes_accessed),
    )(x, w1, b1, w2, b2, w3, b3)

    # Slice padded batch rows / padded action columns off; return f32 Q values.
    return out[:B, :num_actions].astype(jnp.float32)


def init_dqn_params(key, state_space_size, action_space_size, hidden=HIDDEN):
    """Deterministic synthetic init matching nn.Linear scaling.

    Weights are stored pre-transposed as (in, out) in bf16 (MXU-native);
    biases as (1, out) f32. fc3 is pre-padded to a 128-lane output slab so
    the forward pass never pads weights per call.
    """
    ks = jax.random.split(key, 6)

    def linear(kw, kb, fan_in, fan_out, pad_to=None):
        bound = 1.0 / jnp.sqrt(fan_in)
        w = jax.random.uniform(kw, (fan_in, fan_out), jnp.float32, -bound, bound)
        b = jax.random.uniform(kb, (1, fan_out), jnp.float32, -bound, bound)
        if pad_to is not None and pad_to != fan_out:
            w = jnp.pad(w, ((0, 0), (0, pad_to - fan_out)))
            b = jnp.pad(b, ((0, 0), (0, pad_to - fan_out)))
        return w.astype(jnp.bfloat16), b

    w1, b1 = linear(ks[0], ks[1], state_space_size, hidden)
    w2, b2 = linear(ks[2], ks[3], hidden, hidden)
    a_pad = _round_up(action_space_size, LANE)
    w3, b3 = linear(ks[4], ks[5], hidden, action_space_size, pad_to=a_pad)
    return (w1, b1, w2, b2, w3, b3)


def dqn_reference(state, params, num_actions):
    """Plain-JAX reference of the PyTorch forward pass with the same
    bf16-weight / bf16-activation / f32-accumulate recipe as the kernel."""
    w1, b1, w2, b2, w3, b3 = params

    def qdot(x, w):
        return jnp.dot(x.astype(jnp.bfloat16), w, preferred_element_type=jnp.float32)

    h1 = jnp.maximum(qdot(state, w1) + b1, 0.0)
    h2 = jnp.maximum(qdot(h1, w2) + b2, 0.0)
    q = qdot(h2, w3) + b3
    return q[:, :num_actions]


if __name__ == "__main__":
    # Small shapes consistent with the module: state-vector game observation.
    BATCH = 2
    STATE_SPACE_SIZE = 8
    ACTION_SPACE_SIZE = 4

    key = jax.random.PRNGKey(0)
    k_params, k_state, k_state2 = jax.random.split(key, 3)

    params = init_dqn_params(k_params, STATE_SPACE_SIZE, ACTION_SPACE_SIZE)
    state = jax.random.normal(k_state, (BATCH, STATE_SPACE_SIZE), jnp.float32)

    q_kernel = jax.block_until_ready(
        dqn_forward(state, params, num_actions=ACTION_SPACE_SIZE))
    q_ref = jax.block_until_ready(
        dqn_reference(state, params, ACTION_SPACE_SIZE))
    assert q_kernel.shape == (BATCH, ACTION_SPACE_SIZE)
    assert jnp.allclose(q_kernel, q_ref, atol=1e-2, rtol=1e-2), (
        f"mismatch:\n{q_kernel}\nvs\n{q_ref}")

    # Replay-buffer-sized batch: default path (single full-extent tile on
    # v5e/v6e, 2 parallel tiles on v7x) ...
    state_big = jax.random.normal(k_state2, (300, STATE_SPACE_SIZE), jnp.float32)
    q_big = jax.block_until_ready(
        dqn_forward(state_big, params, num_actions=ACTION_SPACE_SIZE))
    q_big_ref = jax.block_until_ready(
        dqn_reference(state_big, params, ACTION_SPACE_SIZE))
    assert q_big.shape == (300, ACTION_SPACE_SIZE)
    assert jnp.allclose(q_big, q_big_ref, atol=1e-2, rtol=1e-2)

    # ... and the explicitly 2-tile path (exercises batch padding + the
    # multi-step "parallel" grid, regardless of which TPU generation runs it).
    q_big2 = jax.block_until_ready(
        dqn_forward(state_big, params, num_actions=ACTION_SPACE_SIZE,
                    num_batch_tiles=2))
    assert jnp.allclose(q_big2, q_big_ref, atol=1e-2, rtol=1e-2)

    print("KERNEL_OK")
</pallas_src>

<mosaic_0001>
module attributes {stable_mosaic.version = 11 : i64} {
  func.func @dqn_kernel(%arg0: i32, %arg1: memref<2x8xf32, #tpu.memory_space<vmem>>, %arg2: memref<8x128xbf16, #tpu.memory_space<vmem>>, %arg3: memref<1x128xf32, #tpu.memory_space<vmem>>, %arg4: memref<128x128xbf16, #tpu.memory_space<vmem>>, %arg5: memref<1x128xf32, #tpu.memory_space<vmem>>, %arg6: memref<128x128xbf16, #tpu.memory_space<vmem>>, %arg7: memref<1x128xf32, #tpu.memory_space<vmem>>, %arg8: memref<2x128xbf16, #tpu.memory_space<vmem>>) attributes {dimension_semantics = [#tpu.dimension_semantics<parallel>], iteration_bounds = array<i64: 1>, scalar_prefetch = 0 : i64, scratch_operands = 0 : i64, tpu.core_type = #tpu.core_type<tc>, window_params = [{transform_indices = @transform_0, window_bounds = array<i64: 2, 8>}, {pipeline_mode = #tpu.pipeline_mode<synchronous>, transform_indices = @transform_1, window_bounds = array<i64: 8, 128>}, {pipeline_mode = #tpu.pipeline_mode<synchronous>, transform_indices = @transform_2, window_bounds = array<i64: 1, 128>}, {pipeline_mode = #tpu.pipeline_mode<synchronous>, transform_indices = @transform_3, window_bounds = array<i64: 128, 128>}, {pipeline_mode = #tpu.pipeline_mode<synchronous>, transform_indices = @transform_4, window_bounds = array<i64: 1, 128>}, {pipeline_mode = #tpu.pipeline_mode<synchronous>, transform_indices = @transform_5, window_bounds = array<i64: 128, 128>}, {pipeline_mode = #tpu.pipeline_mode<synchronous>, transform_indices = @transform_6, window_bounds = array<i64: 1, 128>}, {transform_indices = @transform_7, window_bounds = array<i64: 2, 128>}]} {
    %c0 = arith.constant 0 : index
    %c0_0 = arith.constant 0 : index
    %0 = vector.load %arg1[%c0, %c0_0] : memref<2x8xf32, #tpu.memory_space<vmem>>, vector<2x8xf32>
    %1 = arith.truncf %0 : vector<2x8xf32> to vector<2x8xbf16>
    %c0_1 = arith.constant 0 : index
    %c0_2 = arith.constant 0 : index
    %2 = vector.load %arg2[%c0_1, %c0_2] : memref<8x128xbf16, #tpu.memory_space<vmem>>, vector<8x128xbf16>
    %cst = arith.constant dense<0.000000e+00> : vector<2x128xf32>
    %3 = tpu.matmul %1, %2, %cst {dimension_numbers = #tpu.dot_dimension_numbers<[1], [0], [0], [1], [0, 0, 1, 1], [], []>} : vector<2x8xbf16>, vector<8x128xbf16>, vector<2x128xf32> -> vector<2x128xf32>
    %c0_3 = arith.constant 0 : index
    %c0_4 = arith.constant 0 : index
    %4 = vector.load %arg3[%c0_3, %c0_4] : memref<1x128xf32, #tpu.memory_space<vmem>>, vector<1x128xf32>
    %5 = vector.broadcast %4 : vector<1x128xf32> to vector<2x128xf32>
    %6 = arith.addf %3, %5 : vector<2x128xf32>
    %cst_5 = arith.constant 0.000000e+00 : f32
    %7 = vector.broadcast %cst_5 : f32 to vector<2x128xf32>
    %8 = arith.maximumf %6, %7 : vector<2x128xf32>
    %9 = arith.truncf %8 : vector<2x128xf32> to vector<2x128xbf16>
    %c0_6 = arith.constant 0 : index
    %c0_7 = arith.constant 0 : index
    %10 = vector.load %arg4[%c0_6, %c0_7] : memref<128x128xbf16, #tpu.memory_space<vmem>>, vector<128x128xbf16>
    %cst_8 = arith.constant dense<0.000000e+00> : vector<2x128xf32>
    %11 = tpu.matmul %9, %10, %cst_8 {dimension_numbers = #tpu.dot_dimension_numbers<[1], [0], [0], [1], [0, 0, 1, 1], [], []>} : vector<2x128xbf16>, vector<128x128xbf16>, vector<2x128xf32> -> vector<2x128xf32>
    %c0_9 = arith.constant 0 : index
    %c0_10 = arith.constant 0 : index
    %12 = vector.load %arg5[%c0_9, %c0_10] : memref<1x128xf32, #tpu.memory_space<vmem>>, vector<1x128xf32>
    %13 = vector.broadcast %12 : vector<1x128xf32> to vector<2x128xf32>
    %14 = arith.addf %11, %13 : vector<2x128xf32>
    %cst_11 = arith.constant 0.000000e+00 : f32
    %15 = vector.broadcast %cst_11 : f32 to vector<2x128xf32>
    %16 = arith.maximumf %14, %15 : vector<2x128xf32>
    %17 = arith.truncf %16 : vector<2x128xf32> to vector<2x128xbf16>
    %c0_12 = arith.constant 0 : index
    %c0_13 = arith.constant 0 : index
    %18 = vector.load %arg6[%c0_12, %c0_13] : memref<128x128xbf16, #tpu.memory_space<vmem>>, vector<128x128xbf16>
    %cst_14 = arith.constant dense<0.000000e+00> : vector<2x128xf32>
    %19 = tpu.matmul %17, %18, %cst_14 {dimension_numbers = #tpu.dot_dimension_numbers<[1], [0], [0], [1], [0, 0, 1, 1], [], []>} : vector<2x128xbf16>, vector<128x128xbf16>, vector<2x128xf32> -> vector<2x128xf32>
    %c0_15 = arith.constant 0 : index
    %c0_16 = arith.constant 0 : index
    %20 = vector.load %arg7[%c0_15, %c0_16] : memref<1x128xf32, #tpu.memory_space<vmem>>, vector<1x128xf32>
    %21 = vector.broadcast %20 : vector<1x128xf32> to vector<2x128xf32>
    %22 = arith.addf %19, %21 : vector<2x128xf32>
    %23 = arith.truncf %22 : vector<2x128xf32> to vector<2x128xbf16>
    %c0_17 = arith.constant 0 : index
    %c0_18 = arith.constant 0 : index
    %24 = vector.load %arg8[%c0_17, %c0_18] : memref<2x128xbf16, #tpu.memory_space<vmem>>, vector<2x128xbf16>
    tpu.vector_store %arg8[%c0_17, %c0_18], %23 {strides = array<i32>} : memref<2x128xbf16, #tpu.memory_space<vmem>>, vector<2x128xbf16>,
    return
  }
  func.func @transform_0(%arg0: i32) -> (i32, i32) {
    %c0_i32 = arith.constant 0 : i32
    %c0_i32_0 = arith.constant 0 : i32
    return %arg0, %c0_i32 : i32, i32
  }
  func.func @transform_1(%arg0: i32) -> (i32, i32) {
    %c0_i32 = arith.constant 0 : i32
    %c0_i32_0 = arith.constant 0 : i32
    %c0_i32_1 = arith.constant 0 : i32
    return %c0_i32, %c0_i32_0 : i32, i32
  }
  func.func @transform_2(%arg0: i32) -> (i32, i32) {
    %c0_i32 = arith.constant 0 : i32
    %c0_i32_0 = arith.constant 0 : i32
    %c0_i32_1 = arith.constant 0 : i32
    return %c0_i32, %c0_i32_0 : i32, i32
  }
  func.func @transform_3(%arg0: i32) -> (i32, i32) {
    %c0_i32 = arith.constant 0 : i32
    %c0_i32_0 = arith.constant 0 : i32
    %c0_i32_1 = arith.constant 0 : i32
    return %c0_i32, %c0_i32_0 : i32, i32
  }
  func.func @transform_4(%arg0: i32) -> (i32, i32) {
    %c0_i32 = arith.constant 0 : i32
    %c0_i32_0 = arith.constant 0 : i32
    %c0_i32_1 = arith.constant 0 : i32
    return %c0_i32, %c0_i32_0 : i32, i32
  }
  func.func @transform_5(%arg0: i32) -> (i32, i32) {
    %c0_i32 = arith.constant 0 : i32
    %c0_i32_0 = arith.constant 0 : i32
    %c0_i32_1 = arith.constant 0 : i32
    return %c0_i32, %c0_i32_0 : i32, i32
  }
  func.func @transform_6(%arg0: i32) -> (i32, i32) {
    %c0_i32 = arith.constant 0 : i32
    %c0_i32_0 = arith.constant 0 : i32
    %c0_i32_1 = arith.constant 0 : i32
    return %c0_i32, %c0_i32_0 : i32, i32
  }
  func.func @transform_7(%arg0: i32) -> (i32, i32) {
    %c0_i32 = arith.constant 0 : i32
    %c0_i32_0 = arith.constant 0 : i32
    return %arg0, %c0_i32 : i32, i32
  }
}

</mosaic_0001>

<bundles_post_ra>
// kernel: dqn_forward.1
= control target key start
LH: loop header
LB: loop body
LE: loop exit
PB: predicated region body
PF: predicated region fallthrough
CT: control target
= control target key end

     0   :  { %12 = vsyncpa [#allocation3], 0  ;;  %s706_s0 = inlined_call_operand.hbm [shape: f32[2,8], index: 0, kind: input, shape index: {}]   ;;  %s707_s1 = inlined_call_operand.hbm [shape: bf16[8,128], index: 1, kind: input, shape index: {}]   ;;  %s708_s2 = inlined_call_operand.vmem [shape: f32[1,128], index: 2, kind: input, shape index: {}]   ;;  %s709_s3 = inlined_call_operand.hbm [shape: bf16[128,128], index: 3, kind: input, shape index: {}]   ;;  %s710_s4 = inlined_call_operand.vmem [shape: f32[1,128], index: 4, kind: input, shape index: {}]   ;;  %s711_s5 = inlined_call_operand.hbm [shape: bf16[128,128], index: 5, kind: input, shape index: {}]   ;;  %s712_s6 = inlined_call_operand.vmem [shape: f32[1,128], index: 6, kind: input, shape index: {}]   ;;  %s713_s7 = inlined_call_operand.vmem [shape: bf16[2,128], index: 7, kind: output, shape index: {}]  }
   0x1   :  { %13 = vsyncpa [#allocation5], 0 }
   0x2   :  { %14 = vsyncpa [#allocation8], 0  ;;  %s575_s24 = smov [#allocation4]   ;;  %s576_s26 = smov [#allocation2]  }
   0x3   :  { %s31_s25 = sshll.u32 %s575_s24, 4  ;;  %s21_s27 = sshll.u32 %s576_s26, 4  ;;  %s32_s25 = int_to_ptr.vmem [resolvable:$true] %s31_s25  ;;  %s22_s27 = int_to_ptr.vmem [resolvable:$true] %s21_s27 }
   0x4   :  { %s481_s30 = scalar_lea.hbm %s707_s1, 64 }
   0x5   :  { %p482_p0 = scmp.ne.s32.totalorder %s707_s1, %s481_s30  ;;  %p485_p1 = scmp.lt.u32.totalorder %s481_s30, %s707_s1 }
   0x7   :  { %p487_p2 = pnand %p485_p1, %p482_p0 }
   0x9   :  { %490 = shalt.err (!%p487_p2)
}
   0xa   :  { %s491_s12 = scalar_lea.vmem %s32_s25, 64  ;;  %p496_p4 = scmp.lt.s32.totalorder %s32_s25, %s32_s25 }
   0xb   :  { %p492_p3 = scmp.ne.s32.totalorder %s32_s25, %s491_s12  ;;  %p497_p5 = scmp.lt.s32.totalorder %s491_s12, %s491_s12 }
   0xd   :  { %p498_p6 = por %p497_p5, %p496_p4 }
   0xf   :  { %p499_p7 = pnand %p498_p6, %p492_p3 }
  0x11   :  { %502 = shalt.err (!%p499_p7)
}
  0x12   :  { %34 = dma.hbm_to_vmem [thread:$0]  %s707_s1, 64, %s32_s25, [#allocation5]  }
  0x13   :  { %s503_s17 = scalar_lea.hbm %s706_s0, 32 }
  0x14   :  { %p504_p8 = scmp.ne.s32.totalorder %s706_s0, %s503_s17  ;;  %p507_p9 = scmp.lt.u32.totalorder %s503_s17, %s706_s0 }
  0x16   :  { %p509_p10 = pnand %p507_p9, %p504_p8 }
  0x18   :  { %512 = shalt.err (!%p509_p10)
}
  0x19   :  { %s513_s22 = scalar_lea.vmem %s22_s27, 32  ;;  %p518_p12 = scmp.lt.s32.totalorder %s22_s27, %s22_s27 }
  0x1a   :  { %p514_p11 = scmp.ne.s32.totalorder %s22_s27, %s513_s22  ;;  %p519_p13 = scmp.lt.s32.totalorder %s513_s22, %s513_s22 }
  0x1c   :  { %p520_p0 = por %p519_p13, %p518_p12 }
  0x1e   :  { %p521_p1 = pnand %p520_p0, %p514_p11 }
  0x20   :  { %524 = shalt.err (!%p521_p1)
}
  0x21   :  { %24 = dma.hbm_to_vmem [thread:$0]  %s706_s0, 32, %s22_s27, [#allocation3]  }
  0x22   :  { %s577_s24 = smov [#allocation6]   ;;  %s525_s29 = scalar_lea.hbm %s709_s3, 1024 }
  0x23   :  { %s42_s25 = sshll.u32 %s577_s24, 4  ;;  %p526_p2 = scmp.ne.s32.totalorder %s709_s3, %s525_s29  ;;  %s43_s25 = int_to_ptr.vmem [resolvable:$true] %s42_s25 }
  0x24   :  { %p529_p3 = scmp.lt.u32.totalorder %s525_s29, %s709_s3 }
  0x26   :  { %p531_p4 = pnand %p529_p3, %p526_p2 }
  0x28   :  { %534 = shalt.err (!%p531_p4)
}
  0x29   :  { %s535_s11 = scalar_lea.vmem %s43_s25, 1024  ;;  %p540_p6 = scmp.lt.s32.totalorder %s43_s25, %s43_s25 }
  0x2a   :  { %p536_p5 = scmp.ne.s32.totalorder %s43_s25, %s535_s11  ;;  %p541_p7 = scmp.lt.s32.totalorder %s535_s11, %s535_s11 }
  0x2c   :  { %p542_p8 = por %p541_p7, %p540_p6 }
  0x2e   :  { %p543_p9 = pnand %p542_p8, %p536_p5 }
  0x30   :  { %546 = shalt.err (!%p543_p9)
}
  0x31   :  { %s578_s0 = smov 64   ;;  %s579_s27 = smov 4  }
  0x32   :  { %48 = dma.hbm_to_vmem [thread:$0]  %s709_s3, 1024, %s43_s25, [#allocation5], %s578_s0, %s578_s0, %s579_s27  }
  0x33   :  { %s580_s14 = smov [#allocation7]   ;;  %s547_s18 = scalar_lea.hbm %s711_s5, 1024 }
  0x34   :  { %s56_s15 = sshll.u32 %s580_s14, 4  ;;  %p548_p10 = scmp.ne.s32.totalorder %s711_s5, %s547_s18  ;;  %s57_s15 = int_to_ptr.vmem [resolvable:$true] %s56_s15 }
  0x35   :  { %p551_p11 = scmp.lt.u32.totalorder %s547_s18, %s711_s5 }
  0x37   :  { %p553_p12 = pnand %p551_p11, %p548_p10 }
  0x39   :  { %556 = shalt.err (!%p553_p12)
}
  0x3a   :  { %s557_s1 = scalar_lea.vmem %s57_s15, 1024  ;;  %p562_p0 = scmp.lt.s32.totalorder %s57_s15, %s57_s15 }
  0x3b   :  { %p558_p13 = scmp.ne.s32.totalorder %s57_s15, %s557_s1  ;;  %p563_p1 = scmp.lt.s32.totalorder %s557_s1, %s557_s1 }
  0x3d   :  { %p564_p2 = por %p563_p1, %p562_p0 }
  0x3f   :  { %p565_p3 = pnand %p564_p2, %p558_p13 }
  0x41   :  { %568 = shalt.err (!%p565_p3)
}
  0x42   :  { %62 = dma.hbm_to_vmem [thread:$0]  %s711_s5, 1024, %s57_s15, [#allocation8], %s578_s0, %s578_s0, %s579_s27  }
  0x43   :  { %569 = dma.done.wait [#allocation3], 32  }
  0x44   :  { %570 = vsyncadd [#allocation3], 4294967264 }
  0x45   :  { %571 = dma.done.wait [#allocation5], 1088  }
  0x46   :  { %572 = vsyncadd [#allocation5], 4294966208 }
  0x47   :  { %573 = dma.done.wait [#allocation8], 1024  }
  0x48   :  { %574 = vsyncadd [#allocation8], 4294966272  ;;  %v581_v0 = vmov 0.0   ;;  %vm582_vm0 = vmmov 0   ;;  %vm92_vm1 = vcmask 1043456   ;;  %v465_v5 = vld [vmem:[#allocation6] sm:$0xff]  }
  0x49   :  { %411 = vmatprep.subr.bf16.mxu0 %v581_v0  ;;  %413 = vmatprep.mubr.msk.bf16.mxu0 %vm582_vm0, %v581_v0  ;;  %v80_v1 = vld [vmem:[#allocation4] sm:$0xf]  ;;  %v78_v2 = vld [vmem:[#allocation2] sm:$0x3]  ;;  %vm88_vm2 = vcmask 64512   ;;  %v466_v6 = vld [vmem:[#allocation6 + $0x8] sm:$0xff]  }
  0x4a   :  { %417 = vmatprep.subr.bf16.mxu1 %v581_v0  ;;  %433 = vmatprep.mubr.msk.bf16.mxu1 %vm582_vm0, %v581_v0  ;;  %v94_v3 = vsel %vm92_vm1, %v80_v1, 0  ;;  %v79_v4 = vpack.c.bf16 %v78_v2, %v78_v2  ;;  %v467_v7 = vld [vmem:[#allocation6 + $0x10] sm:$0xff]   ;;  %v468_v8 = vld [vmem:[#allocation6 + $0x18] sm:$0xff]   ;;  %v469_v9 = vld [vmem:[#allocation6 + $0x20] sm:$0xff]  }
  0x4b   :  { %412 = vmatpush3.bf16.msra.mxu0 %v94_v3  ;;  %418 = vmatpush3.bf16.msra.mxu1 %v465_v5  ;;  %v470_v10 = vld [vmem:[#allocation6 + $0x28] sm:$0xff]   ;;  %v471_v11 = vld [vmem:[#allocation6 + $0x30] sm:$0xff]   ;;  %v472_v12 = vld [vmem:[#allocation6 + $0x38] sm:$0xff]  }
  0x4c   :  { %437 = vmatprep.subr.bf16.mxu0 %v581_v0  ;;  %419 = vmatprep.subr.bf16.mxu1 %v581_v0  ;;  %v473_v13 = vld [vmem:[#allocation7] sm:$0xff]   ;;  %v474_v14 = vld [vmem:[#allocation7 + $0x8] sm:$0xff]   ;;  %v475_v15 = vld [vmem:[#allocation7 + $0x10] sm:$0xff]  }
  0x4d   :  { %v476_v16 = vld [vmem:[#allocation7 + $0x18] sm:$0xff]   ;;  %v477_v17 = vld [vmem:[#allocation7 + $0x20] sm:$0xff]   ;;  %v478_v18 = vld [vmem:[#allocation7 + $0x28] sm:$0xff]  }
  0x4e   :  { %414 = vmatmul.mubr.msk.bf16.vlgmr.msra.gmra.mrb[0].mxu0 %vm88_vm2, %v79_v4  ;;  %v371_v19 = vld [vmem:[%s708_s2] ss:$0 sm:$0xff]  ;;  %v479_v27 = vld [vmem:[#allocation7 + $0x30] sm:$0xff]  }
  0x4f   :  { %453 = vmatprep.mubr.msk.bf16.mxu0 %vm582_vm0, %v581_v0  ;;  %420 = vmatpush3.bf16.msra.mxu1 %v466_v6  ;;  %v480_v28 = vld [vmem:[#allocation7 + $0x38] sm:$0xff]  }
  0x50   :  { %421 = vmatprep.subr.bf16.mxu1 %v581_v0  ;;  %438 = vmatpush3.bf16.msra.mxu0 %v473_v13  ;;  %v373_v29 = vld [vmem:[%s710_s4] ss:$0 sm:$0xff] }
  0x51   :  { %439 = vmatprep.subr.bf16.mxu0 %v581_v0  ;;  %v382_v37 = vld [vmem:[%s712_s6] ss:$0 sm:$0xff] }
  0x53   :  { %422 = vmatpush3.bf16.msra.mxu1 %v467_v7 }
  0x54   :  { %423 = vmatprep.subr.bf16.mxu1 %v581_v0  ;;  %440 = vmatpush3.bf16.msra.mxu0 %v474_v14 }
  0x55   :  { %441 = vmatprep.subr.bf16.mxu0 %v581_v0 }
  0x57   :  { %424 = vmatpush3.bf16.msra.mxu1 %v468_v8 }
  0x58   :  { %425 = vmatprep.subr.bf16.mxu1 %v581_v0  ;;  %442 = vmatpush3.bf16.msra.mxu0 %v475_v15 }
  0x59   :  { %443 = vmatprep.subr.bf16.mxu0 %v581_v0 }
  0x5b   :  { %426 = vmatpush3.bf16.msra.mxu1 %v469_v9 }
  0x5c   :  { %427 = vmatprep.subr.bf16.mxu1 %v581_v0  ;;  %444 = vmatpush3.bf16.msra.mxu0 %v476_v16 }
  0x5d   :  { %445 = vmatprep.subr.bf16.mxu0 %v581_v0 }
  0x5f   :  { %428 = vmatpush3.bf16.msra.mxu1 %v470_v10 }
  0x60   :  { %429 = vmatprep.subr.bf16.mxu1 %v581_v0  ;;  %446 = vmatpush3.bf16.msra.mxu0 %v477_v17 }
  0x61   :  { %447 = vmatprep.subr.bf16.mxu0 %v581_v0 }
  0x63   :  { %430 = vmatpush3.bf16.msra.mxu1 %v471_v11 }
  0x64   :  { %431 = vmatprep.subr.bf16.mxu1 %v581_v0  ;;  %448 = vmatpush3.bf16.msra.mxu0 %v478_v18 }
  0x65   :  { %449 = vmatprep.subr.bf16.mxu0 %v581_v0 }
  0x67   :  { %432 = vmatpush3.bf16.msra.mxu1 %v472_v12 }
  0x68   :  { %450 = vmatpush3.bf16.msra.mxu0 %v479_v27 }
  0x69   :  { %451 = vmatprep.subr.bf16.mxu0 %v581_v0 }
  0x6c   :  { %452 = vmatpush3.bf16.msra.mxu0 %v480_v28 }
 0x121   :  { %v130_v20 = vpop.f32.mrb[0].mxu0 }
 0x122   :  { %v131_v21 = vadd.f32 %v371_v19, %v130_v20  ;;  %v415_v22 = vpop.f32.mrb[1].mxu0 }
 0x123   :  { %v133_v23 = vpop.f32.mrb[2].mxu0 }
 0x124   :  { %v136_v24 = vmax.f32 %v131_v21, 0.0  ;;  %v416_v25 = vpop.f32.mrb[3].mxu0 }
 0x126   :  { %v137_v26 = vpack.c.bf16 %v136_v24, %v136_v24 }
 0x128   :  { %434 = vmatmul.mubr.bf16.vlgmr.msra.gmra.mrb[0].mxu1 %v137_v26 }
 0x1fb   :  { %v243_v30 = vpop.f32.mrb[0].mxu1 }
 0x1fc   :  { %v244_v31 = vadd.f32 %v373_v29, %v243_v30  ;;  %v435_v32 = vpop.f32.mrb[1].mxu1 }
 0x1fd   :  { %v246_v33 = vpop.f32.mrb[2].mxu1 }
 0x1fe   :  { %v249_v34 = vmax.f32 %v244_v31, 0.0  ;;  %v436_v35 = vpop.f32.mrb[3].mxu1 }
 0x200   :  { %v250_v36 = vpack.c.bf16 %v249_v34, %v249_v34 }
 0x202   :  { %454 = vmatmul.mubr.bf16.vlgmr.msra.gmra.mrb[4].mxu0 %v250_v36 }
 0x2d5   :  { %v356_v38 = vpop.f32.mrb[4].mxu0 }
 0x2d6   :  { %v357_v39 = vadd.f32 %v382_v37, %v356_v38  ;;  %v455_v40 = vpop.f32.mrb[5].mxu0 }
 0x2d7   :  { %v359_v41 = vpop.f32.mrb[6].mxu0 }
 0x2d8   :  { %v362_v42 = vpack.c.bf16 %v357_v39, %v357_v39  ;;  %v456_v43 = vpop.f32.mrb[7].mxu0 }
 0x2da   :  { %363 = vst [vmem:[%s713_s7] sm:$0x1] %v362_v42 }
 0x2db   :  { %368 = vsyncpa [#allocation3], 1 }
 0x2dc   :  { %369 = vsyncpa [#allocation5], 1 }
 0x2dd   :  { %370 = vsyncpa [#allocation8], 1 }

</bundles_post_ra>
